<compile_context>
chip_gen: v5e
topology: v5e:2x2
jax: 0.10.0
libtpu: 0.0.40
codegen_flags: <defaults>
</compile_context>

<pallas_src>
import functools

import jax
import jax.numpy as jnp
from jax.experimental import pallas as pl
from jax.experimental.pallas import tpu as pltpu

_EPS = 1e-6                 # PyTorch F.pairwise_distance default eps
_LANES = 128                # lane width: partial sums are stored lane-dense

# Conservative (v7x, 64 MiB VMEM per TC) configuration; used as the fallback
# whenever hardware introspection is unavailable.
_SMALL_VMEM_INPUT_BUDGET = 24 * 1024 * 1024
_SMALL_VMEM_LIMIT_BYTES = 40 * 1024 * 1024
# Roomier configuration for 128-MiB-VMEM parts (v5e / v6e).
_LARGE_VMEM_INPUT_BUDGET = 48 * 1024 * 1024
_LARGE_VMEM_LIMIT_BYTES = 80 * 1024 * 1024


def _vmem_config():
    """(input_buffer_budget, vmem_limit_bytes) tuned per TPU generation."""
    try:
        vmem_bytes = pltpu.get_tpu_info().vmem_capacity_bytes
    except Exception:
        vmem_bytes = 0  # unknown -> use the conservative config (safe everywhere)
    if vmem_bytes >= 100 * 1024 * 1024:          # v5e / v6e: 128 MiB physical
        return _LARGE_VMEM_INPUT_BUDGET, _LARGE_VMEM_LIMIT_BYTES
    return _SMALL_VMEM_INPUT_BUDGET, _SMALL_VMEM_LIMIT_BYTES


def _pick_batch_tile(B: int, D: int, itemsize: int, input_budget: int) -> int:
    """Largest batch tile whose 3 x 2 buffered input copies fit the budget,
    additionally guaranteeing >= 2 grid steps for B >= 16 (megacore)."""
    per_row = 3 * 2 * D * itemsize               # 3 inputs, double-buffered
    tb = max(8, input_budget // per_row)         # bytes-based, no fixed row cap
    if B >= 16:
        # Keep at least two tiles so the "parallel" grid axis can be sharded
        # across both v7x TensorCores (harmless ~0.35us extra step elsewhere).
        half = (((B + 1) // 2) + 7) // 8 * 8     # ceil(B/2) rounded up to 8
        tb = min(tb, half)
    if tb >= B:
        return B                                 # single tile: block == full array
    return max(8, (tb // 8) * 8)                 # 2nd-to-last block dim: mult of 8


def _triplet_kernel(a_ref, p_ref, n_ref, o_ref, *, margin, batch, tile,
                    needs_mask):
    a = a_ref[...].astype(jnp.float32)
    p = p_ref[...].astype(jnp.float32)
    n = n_ref[...].astype(jnp.float32)

    # Pairwise L2 distance along the feature axis (eps added to the
    # difference, exactly like F.pairwise_distance).
    dp = jnp.sqrt(jnp.sum((a - p + _EPS) ** 2, axis=-1, keepdims=True))
    dn = jnp.sqrt(jnp.sum((a - n + _EPS) ** 2, axis=-1, keepdims=True))

    losses = jnp.maximum(dp - dn + margin, 0.0)            # (TB, 1)

    if needs_mask:
        # Only compiled in when B % TB != 0: rows of the padded last tile are
        # undefined (possibly NaN/Inf) and must be dropped with a select.
        i = pl.program_id(0)
        row = jax.lax.broadcasted_iota(jnp.int32, losses.shape, 0) + i * tile
        losses = jnp.where(row < batch, losses, 0.0)

    # One lane-dense (1, 128) partial-sum block per grid step: tile sum in
    # lane 0, zeros elsewhere, so the wrapper can do a plain contiguous sum.
    tile_sum = jnp.sum(losses)
    lane = jax.lax.broadcasted_iota(jnp.int32, (1, _LANES), 1)
    o_ref[...] = jnp.where(lane == 0, tile_sum, 0.0)


def triplet_loss(anchor, positive, negative, margin: float = 1.0,
                 tile_rows: int | None = None):
    assert anchor.shape == positive.shape == negative.shape
    B, D = anchor.shape
    itemsize = jnp.dtype(anchor.dtype).itemsize

    input_budget, vmem_limit = _vmem_config()

    tb = (tile_rows if tile_rows is not None
          else _pick_batch_tile(B, D, itemsize, input_budget))
    tb = min(tb, B)
    if tb < B:
        tb = max(8, (tb // 8) * 8)               # keep block rows a multiple of 8
    num_tiles = pl.cdiv(B, tb)
    needs_mask = (B % tb) != 0

    cost = pl.CostEstimate(
        flops=10 * B * D,
        transcendentals=2 * B,
        bytes_accessed=3 * B * D * itemsize + num_tiles * _LANES * 4,
    )

    kernel = functools.partial(
        _triplet_kernel, margin=float(margin), batch=B, tile=tb,
        needs_mask=needs_mask)

    partials = pl.pallas_call(
        kernel,
        out_shape=jax.ShapeDtypeStruct((num_tiles, _LANES), jnp.float32),
        grid=(num_tiles,),
        in_specs=[
            pl.BlockSpec((tb, D), lambda i: (i, 0)),
            pl.BlockSpec((tb, D), lambda i: (i, 0)),
            pl.BlockSpec((tb, D), lambda i: (i, 0)),
        ],
        out_specs=pl.BlockSpec((1, _LANES), lambda i: (i, 0)),
        compiler_params=pltpu.CompilerParams(
            dimension_semantics=("parallel",),
            vmem_limit_bytes=vmem_limit,
        ),
        cost_estimate=cost,
    )(anchor, positive, negative)

    # Tiny final reduction: contiguous sum over all partial blocks, mean over B.
    return jnp.sum(partials) / B


def _ref_triplet_loss(anchor, positive, negative, margin=1.0):
    dp = jnp.sqrt(jnp.sum((anchor - positive + _EPS) ** 2, axis=-1))
    dn = jnp.sqrt(jnp.sum((anchor - negative + _EPS) ** 2, axis=-1))
    return jnp.mean(jnp.maximum(dp - dn + margin, 0.0))


if __name__ == "__main__":
    key = jax.random.PRNGKey(0)

    # Case 1: small, single-tile path (B=8, D=32).
    ka, kp, kn, key = jax.random.split(key, 4)
    B, D = 8, 32
    a = jax.random.normal(ka, (B, D), dtype=jnp.float32)
    p = jax.random.normal(kp, (B, D), dtype=jnp.float32)
    n = jax.random.normal(kn, (B, D), dtype=jnp.float32)

    loss1 = triplet_loss(a, p, n, margin=1.0)
    jax.block_until_ready(loss1)
    ref1 = _ref_triplet_loss(a, p, n, margin=1.0)
    assert jnp.allclose(loss1, ref1, rtol=1e-5, atol=1e-5), (loss1, ref1)

    # Case 2: forced small tile so the tiled grid + partial-tile masking path
    # is exercised (B=20 not a multiple of the 8-row tile -> last tile masked).
    ka, kp, kn, key = jax.random.split(key, 4)
    B2, D2 = 20, 32
    a2 = jax.random.normal(ka, (B2, D2), dtype=jnp.float32)
    p2 = jax.random.normal(kp, (B2, D2), dtype=jnp.float32)
    n2 = jax.random.normal(kn, (B2, D2), dtype=jnp.float32)

    loss2 = triplet_loss(a2, p2, n2, margin=1.0, tile_rows=8)
    jax.block_until_ready(loss2)
    ref2 = _ref_triplet_loss(a2, p2, n2, margin=1.0)
    assert jnp.allclose(loss2, ref2, rtol=1e-5, atol=1e-5), (loss2, ref2)

    # Case 3: auto tile selection with B >= 16 (exercises the >=2-tile cap and
    # the even-split / masked-tail path without a manual tile override).
    ka, kp, kn, key = jax.random.split(key, 4)
    B3, D3 = 24, 32
    a3 = jax.random.normal(ka, (B3, D3), dtype=jnp.float32)
    p3 = jax.random.normal(kp, (B3, D3), dtype=jnp.float32)
    n3 = jax.random.normal(kn, (B3, D3), dtype=jnp.float32)

    loss3 = triplet_loss(a3, p3, n3, margin=1.0)
    jax.block_until_ready(loss3)
    ref3 = _ref_triplet_loss(a3, p3, n3, margin=1.0)
    assert jnp.allclose(loss3, ref3, rtol=1e-5, atol=1e-5), (loss3, ref3)

    print("KERNEL_OK")
</pallas_src>

<mosaic_0001>
module attributes {stable_mosaic.version = 11 : i64} {
  func.func @_triplet_kernel(%arg0: i32, %arg1: memref<8x32xf32, #tpu.memory_space<vmem>>, %arg2: memref<8x32xf32, #tpu.memory_space<vmem>>, %arg3: memref<8x32xf32, #tpu.memory_space<vmem>>, %arg4: memref<1x128xf32, #tpu.memory_space<vmem>>) attributes {dimension_semantics = [#tpu.dimension_semantics<parallel>], iteration_bounds = array<i64: 1>, scalar_prefetch = 0 : i64, scratch_operands = 0 : i64, tpu.core_type = #tpu.core_type<tc>, window_params = [{transform_indices = @transform_0, window_bounds = array<i64: 8, 32>}, {transform_indices = @transform_1, window_bounds = array<i64: 8, 32>}, {transform_indices = @transform_2, window_bounds = array<i64: 8, 32>}, {transform_indices = @transform_3, window_bounds = array<i64: 1, 128>}]} {
    %c0 = arith.constant 0 : index
    %c0_0 = arith.constant 0 : index
    %0 = vector.load %arg1[%c0, %c0_0] : memref<8x32xf32, #tpu.memory_space<vmem>>, vector<8x32xf32>
    %c0_1 = arith.constant 0 : index
    %c0_2 = arith.constant 0 : index
    %1 = vector.load %arg2[%c0_1, %c0_2] : memref<8x32xf32, #tpu.memory_space<vmem>>, vector<8x32xf32>
    %c0_3 = arith.constant 0 : index
    %c0_4 = arith.constant 0 : index
    %2 = vector.load %arg3[%c0_3, %c0_4] : memref<8x32xf32, #tpu.memory_space<vmem>>, vector<8x32xf32>
    %3 = arith.subf %0, %1 : vector<8x32xf32>
    %cst = arith.constant 9.99999997E-7 : f32
    %4 = vector.broadcast %cst : f32 to vector<8x32xf32>
    %5 = arith.addf %3, %4 : vector<8x32xf32>
    %6 = arith.mulf %5, %5 : vector<8x32xf32>
    %cst_5 = arith.constant dense<0.000000e+00> : vector<8xf32>
    %7 = vector.multi_reduction <add>, %6, %cst_5 [1] : vector<8x32xf32> to vector<8xf32>
    %8 = vector.shape_cast %7 : vector<8xf32> to vector<8x1xf32>
    %9 = math.sqrt %8 : vector<8x1xf32>
    %10 = arith.subf %0, %2 : vector<8x32xf32>
    %cst_6 = arith.constant 9.99999997E-7 : f32
    %11 = vector.broadcast %cst_6 : f32 to vector<8x32xf32>
    %12 = arith.addf %10, %11 : vector<8x32xf32>
    %13 = arith.mulf %12, %12 : vector<8x32xf32>
    %cst_7 = arith.constant dense<0.000000e+00> : vector<8xf32>
    %14 = vector.multi_reduction <add>, %13, %cst_7 [1] : vector<8x32xf32> to vector<8xf32>
    %15 = vector.shape_cast %14 : vector<8xf32> to vector<8x1xf32>
    %16 = math.sqrt %15 : vector<8x1xf32>
    %17 = arith.subf %9, %16 : vector<8x1xf32>
    %cst_8 = arith.constant 1.000000e+00 : f32
    %18 = vector.broadcast %cst_8 : f32 to vector<8x1xf32>
    %19 = arith.addf %17, %18 : vector<8x1xf32>
    %cst_9 = arith.constant 0.000000e+00 : f32
    %20 = vector.broadcast %cst_9 : f32 to vector<8x1xf32>
    %21 = arith.maximumf %19, %20 : vector<8x1xf32>
    %22 = vector.shape_cast %21 : vector<8x1xf32> to vector<1x8x1xf32>
    %cst_10 = arith.constant dense<0.000000e+00> : vector<1xf32>
    %23 = vector.multi_reduction <add>, %22, %cst_10 [1, 2] : vector<1x8x1xf32> to vector<1xf32>
    %24 = vector.shape_cast %23 : vector<1xf32> to vector<1x1x1xf32>
    %25 = vector.extract %24[0, 0, 0] : f32 from vector<1x1x1xf32>
    %26 = tpu.iota {dimensions = array<i32: 1>} : vector<1x128xi32>
    %c0_i32 = arith.constant 0 : i32
    %27 = vector.broadcast %c0_i32 : i32 to vector<1x128xi32>
    %28 = arith.cmpi eq, %26, %27 : vector<1x128xi32>
    %cst_11 = arith.constant 0.000000e+00 : f32
    %29 = vector.broadcast %25 : f32 to vector<1x128xf32>
    %30 = vector.broadcast %cst_11 : f32 to vector<1x128xf32>
    %31 = arith.select %28, %29, %30 : vector<1x128xi1>, vector<1x128xf32>
    %c0_12 = arith.constant 0 : index
    %c0_13 = arith.constant 0 : index
    %32 = vector.load %arg4[%c0_12, %c0_13] : memref<1x128xf32, #tpu.memory_space<vmem>>, vector<1x128xf32>
    tpu.vector_store %arg4[%c0_12, %c0_13], %31 {strides = array<i32>} : memref<1x128xf32, #tpu.memory_space<vmem>>, vector<1x128xf32>,
    return
  }
  func.func @transform_0(%arg0: i32) -> (i32, i32) {
    %c0_i32 = arith.constant 0 : i32
    %c0_i32_0 = arith.constant 0 : i32
    return %arg0, %c0_i32 : i32, i32
  }
  func.func @transform_1(%arg0: i32) -> (i32, i32) {
    %c0_i32 = arith.constant 0 : i32
    %c0_i32_0 = arith.constant 0 : i32
    return %arg0, %c0_i32 : i32, i32
  }
  func.func @transform_2(%arg0: i32) -> (i32, i32) {
    %c0_i32 = arith.constant 0 : i32
    %c0_i32_0 = arith.constant 0 : i32
    return %arg0, %c0_i32 : i32, i32
  }
  func.func @transform_3(%arg0: i32) -> (i32, i32) {
    %c0_i32 = arith.constant 0 : i32
    %c0_i32_0 = arith.constant 0 : i32
    return %arg0, %c0_i32 : i32, i32
  }
}

</mosaic_0001>

<bundles_post_ra>
// kernel: tpu_custom_call.1
= control target key start
LH: loop header
LB: loop body
LE: loop exit
PB: predicated region body
PF: predicated region fallthrough
CT: control target
= control target key end

     0   :  { %8 = vsyncpa [#allocation3], 0  ;;  %s282_s0 = inlined_call_operand.hbm [shape: f32[8,32], index: 0, kind: input, shape index: {}]   ;;  %s283_s1 = inlined_call_operand.hbm [shape: f32[8,32], index: 1, kind: input, shape index: {}]   ;;  %s284_s2 = inlined_call_operand.hbm [shape: f32[8,32], index: 2, kind: input, shape index: {}]   ;;  %s285_s3 = inlined_call_operand.hbm [shape: f32[1,128], index: 3, kind: output, shape index: {}]  }
   0x1   :  { %9 = vsyncpa [#allocation6], 0  ;;  %s27_s14 = sshll.u32 %s283_s1, 4  ;;  %s28_s14 = int_to_ptr.hbm [resolvable:$true] %s27_s14 }
   0x2   :  { %10 = vsyncpa [#allocation4], 0  ;;  %s246_s15 = smov [#allocation5]   ;;  %s16_s19 = sshll.u32 %s282_s0, 4  ;;  %s17_s19 = int_to_ptr.hbm [resolvable:$true] %s16_s19 }
   0x3   :  { %s29_s16 = sshll.u32 %s246_s15, 4  ;;  %s247_s20 = smov [#allocation2]   ;;  %s30_s16 = int_to_ptr.vmem [resolvable:$true] %s29_s16 }
   0x4   :  { %32 = dma.hbm_to_vmem [thread:$0]  %s28_s14, 128, %s30_s16, [#allocation6]  }
   0x5   :  { %s18_s21 = sshll.u32 %s247_s20, 4  ;;  %s38_s24 = sshll.u32 %s284_s2, 4  ;;  %s19_s21 = int_to_ptr.vmem [resolvable:$true] %s18_s21  ;;  %s39_s24 = int_to_ptr.hbm [resolvable:$true] %s38_s24 }
   0x6   :  { %21 = dma.hbm_to_vmem [thread:$0]  %s17_s19, 128, %s19_s21, [#allocation3]  }
   0x7   :  { %s248_s1 = smov [#allocation7]  }
   0x8   :  { %s40_s25 = sshll.u32 %s248_s1, 4  ;;  %s41_s25 = int_to_ptr.vmem [resolvable:$true] %s40_s25 }
   0x9   :  { %43 = dma.hbm_to_vmem [thread:$0]  %s39_s24, 128, %s41_s25, [#allocation6]  }
   0xa   :  { %240 = dma.done.wait [#allocation3], 128  }
   0xb   :  { %241 = vsyncadd [#allocation3], 4294967168 }
   0xc   :  { %242 = dma.done.wait [#allocation6], 256  }
   0xd   :  { %243 = vsyncadd [#allocation6], 4294967040  ;;  %v56_v0 = vld [vmem:[#allocation2] sm:$0xff]  ;;  %v57_v1 = vld [vmem:[#allocation5] sm:$0xff]  ;;  %vm62_vm0 = vcmask 261120   ;;  %vm99_vm5 = vcmask 7168   ;;  %v110_v44 = vlaneseq }
   0xe   :  { %v58_v2 = vld [vmem:[#allocation7] sm:$0xff]  ;;  %v59_v3 = vsub.f32 %v56_v0, %v57_v1  ;;  %s249_s0 = smov [#allocation8]   ;;  %s123_s28 = sshll.u32 %s285_s3, 4  ;;  %s124_s28 = int_to_ptr.hbm [resolvable:$true] %s123_s28 }
   0xf   :  { %v78_v4 = vsub.f32 %v56_v0, %v58_v2  ;;  %v111_v45 = vand.u32 127, %v110_v44  ;;  %s121_s2 = sshll.u32 %s249_s0, 4  ;;  %s122_s2 = int_to_ptr.vmem [resolvable:$true] %s121_s2 }
  0x10   :  { %v60_v5 = vadd.f32 1e-06, %v59_v3 }
  0x11   :  { %v79_v7 = vadd.f32 1e-06, %v78_v4  ;;  %vm112_vm6 = vcmp.eq.s32.totalorder %v111_v45, 0 }
  0x12   :  { %v61_v6 = vmul.f32 %v60_v5, %v60_v5 }
  0x13   :  { %v80_v9 = vmul.f32 %v79_v7, %v79_v7 }
  0x14   :  { %v63_v8 = vsel %vm62_vm0, %v61_v6, 0.0 }
  0x15   :  { %64 = vadd.xlane.f32.xlu0 %v63_v8  ;;  %v81_v10 = vsel %vm62_vm0, %v80_v9, 0.0 }
  0x1d   :  { %82 = vadd.xlane.f32.xlu0 %v81_v10 }
  0x88   :  { %v65_v11 = vpop.xlane.xlu0 %64 }
  0x89   :  { %140 = vrsqrt.f32 %v65_v11  ;;  %vm73_vm1 = vcmp.eq.f32.partialorder %v65_v11, inf  ;;  %v76_v28 = vand.u32 2147483648, %v65_v11  ;;  %vm75_vm3 = vcmp.eq.f32.partialorder %v65_v11, 0.0 }
  0x8f   :  { %v141_v12 = vpop.eup %140 }
  0x90   :  { %v67_v13 = vmul.f32 %v141_v12, %v65_v11  ;;  %v83_v14 = vpop.xlane.xlu0 %82 }
  0x91   :  { %142 = vrsqrt.f32 %v83_v14  ;;  %vm91_vm2 = vcmp.eq.f32.partialorder %v83_v14, inf  ;;  %v94_v29 = vand.u32 2147483648, %v83_v14  ;;  %vm93_vm4 = vcmp.eq.f32.partialorder %v83_v14, 0.0 }
  0x92   :  { %v68_v15 = vmul.f32 %v141_v12, %v67_v13 }
  0x94   :  { %v69_v16 = vmul.f32 0.5, %v68_v15 }
  0x96   :  { %v70_v17 = vsub.f32 1.5, %v69_v16 }
  0x97   :  { %v143_v18 = vpop.eup %142 }
  0x98   :  { %v85_v19 = vmul.f32 %v143_v18, %v83_v14  ;;  %v71_v21 = vmul.f32 %v141_v12, %v70_v17 }
  0x9a   :  { %v86_v20 = vmul.f32 %v143_v18, %v85_v19  ;;  %v72_v23 = vmul.f32 %v71_v21, %v65_v11 }
  0x9c   :  { %v87_v22 = vmul.f32 0.5, %v86_v20  ;;  %v74_v26 = vsel %vm73_vm1, %v65_v11, %v72_v23 }
  0x9d   :  { %v77_v31 = vsel %vm75_vm3, %v76_v28, %v74_v26 }
  0x9e   :  { %v88_v24 = vsub.f32 1.5, %v87_v22 }
  0xa0   :  { %v89_v25 = vmul.f32 %v143_v18, %v88_v24 }
  0xa2   :  { %v90_v27 = vmul.f32 %v89_v25, %v83_v14 }
  0xa4   :  { %v92_v30 = vsel %vm91_vm2, %v83_v14, %v90_v27 }
  0xa5   :  { %v95_v32 = vsel %vm93_vm4, %v94_v29, %v92_v30 }
  0xa6   :  { %v96_v33 = vsub.f32 %v77_v31, %v95_v32 }
  0xa8   :  { %v97_v34 = vadd.f32 1.0, %v96_v33 }
  0xaa   :  { %v98_v35 = vmax.f32 %v97_v34, 0.0 }
  0xac   :  { %v100_v36 = vsel %vm99_vm5, %v98_v35, 0.0 }
  0xad   :  { %101 = vadd.xlane.f32.xlu1 %v100_v36 }
 0x120   :  { %v102_v37 = vpop.xlane.xlu1 %101 }
 0x121   :  { %v103_v38 = vrot.slane %v102_v37, 4 }
 0x123   :  { %v104_v39 = vadd.f32 %v103_v38, %v102_v37 }
 0x125   :  { %v105_v40 = vrot.slane %v104_v39, 2 }
 0x127   :  { %v106_v41 = vadd.f32 %v105_v40, %v104_v39 }
 0x129   :  { %v107_v42 = vrot.slane %v106_v41, 1 }
 0x12b   :  { %v108_v43 = vadd.f32 %v107_v42, %v106_v41 }
 0x12d   :  { %134 = vpush %v108_v43 }
 0x15e   :  { %s135_s29 = spop %134 }
 0x15f   :  { %v113_v46 = vstv %s135_s29 }
 0x160   :  { %v114_v47 = vsel %vm112_vm6, %v113_v46, 0.0 }
 0x161   :  { %115 = vst [vmem:[#allocation8] sm:$0x1] %v114_v47 }
 0x162   :  { %126 = dma.vmem_to_hbm [thread:$0]  %s122_s2, 16, %s124_s28, [#allocation4]  }
 0x163   :  { %244 = dma.done.wait [#allocation4], 16  }
 0x164   :  { %245 = vsyncadd [#allocation4], 4294967280 }
 0x165   :  { %131 = vsyncpa [#allocation3], 1 }
 0x166   :  { %132 = vsyncpa [#allocation6], 1 }
 0x167   :  { %133 = vsyncpa [#allocation4], 1 }

</bundles_post_ra>
